<compile_context>
chip_gen: v7x
topology: tpu7x:2x2x1
jax: 0.10.0
libtpu: 0.0.40
codegen_flags: <defaults>
</compile_context>

<pallas_src>
import functools

import jax
import jax.numpy as jnp
from jax import lax
from jax.experimental import pallas as pl
from jax.experimental.pallas import tpu as pltpu

BN_EPS = 1e-5
LANE = 128
FUSED_VMEM_CEILING = 48 << 20     # fused path must fit v7x's 64 MiB/TC VMEM
XW_RESIDENT_CEILING = 16 << 20    # keep xw resident if its buffers fit this


# ----------------------------------------------------------------------------
# small helpers
# ----------------------------------------------------------------------------
def _round_up(n, m):
    return ((n + m - 1) // m) * m


def _choose_tile(dim, max_tile):
    """Largest multiple of 128 dividing `dim` (itself a multiple of 128),
    bounded by max_tile."""
    best = LANE
    t = LANE
    limit = min(max_tile, dim)
    while t <= limit:
        if dim % t == 0:
            best = t
        t += LANE
    return best


def _default_max_tile():
    # v5e/v6e have 128 MiB VMEM -> 2048 A tiles amortize step overhead best;
    # v7x only has 64 MiB per TensorCore -> stay at 1024.
    try:
        vmem = pltpu.get_tpu_info().vmem_capacity_bytes
        return 2048 if vmem >= (96 << 20) else 1024
    except Exception:
        return 1024


def _pad2d(a, rows, cols):
    return jnp.pad(a, ((0, rows - a.shape[0]), (0, cols - a.shape[1])))


def _fold_bn(w, b, gamma, beta, mean, var):
    """Fold eval-mode BatchNorm1d into the preceding linear layer."""
    scale = gamma * lax.rsqrt(var + BN_EPS)            # (1, H)
    return w * scale, (b - mean) * scale + beta


# ----------------------------------------------------------------------------
# Pallas kernels
# ----------------------------------------------------------------------------
def _transform_kernel(x_ref, w_ref, b_ref, o_ref, *, apply_relu):
    # h = x @ W + b  (optionally ReLU).  BN is pre-folded into W/b.
    # Activations are cast to bf16 on-chip so the MXU runs its fast path.
    x = x_ref[...]
    if x.dtype != jnp.bfloat16:
        x = x.astype(jnp.bfloat16)
    h = jnp.dot(x, w_ref[...], preferred_element_type=jnp.float32)
    h = h + b_ref[...]
    if apply_relu:
        h = jnp.maximum(h, 0.0)
    o_ref[...] = h.astype(o_ref.dtype)


def _conv_agg_kernel(a_ref, xw_ref, b_ref, res_ref, o_ref, *, tk, xw_resident):
    # Tiled A @ xw, accumulated directly into the resident f32 output block
    # over the contraction (last) grid axis; in-place epilogue:
    # relu(acc + b') + residual.
    k = pl.program_id(1)

    @pl.when(k == 0)
    def _():
        o_ref[...] = jnp.zeros_like(o_ref)

    if xw_resident:
        start = pl.multiple_of(k * tk, tk)
        xw = xw_ref[pl.ds(start, tk), :]      # slice the VMEM-resident xw
    else:
        xw = xw_ref[...]
    o_ref[...] += jnp.dot(a_ref[...], xw, preferred_element_type=jnp.float32)

    @pl.when(k == pl.num_programs(1) - 1)
    def _():
        h = jnp.maximum(o_ref[...] + b_ref[...], 0.0)
        o_ref[...] = h + res_ref[...]


def _fused_layers_kernel(adj_ref, w_ref, b_ref, h0_ref, o_ref, acc_ref):
    # Persistent multi-layer kernel.  Both bf16 adjacencies and the running
    # state (the resident output block) stay in VMEM across all layers; only
    # the tiny per-layer folded weight/bias are pipelined from HBM.
    l = pl.program_id(0)

    @pl.when(l == 0)
    def _():
        o_ref[...] = h0_ref[...]

    # xw = prev @ W'  (bf16 MXU, f32 accumulation)
    xw = jnp.dot(o_ref[...].astype(jnp.bfloat16), w_ref[0],
                 preferred_element_type=jnp.float32).astype(jnp.bfloat16)

    # alternating edge type: A[l % 2] @ xw  (static adjacency index per branch)
    @pl.when(l % 2 == 0)
    def _():
        acc_ref[...] = jnp.dot(adj_ref[0], xw, preferred_element_type=jnp.float32)

    @pl.when(l % 2 == 1)
    def _():
        acc_ref[...] = jnp.dot(adj_ref[1], xw, preferred_element_type=jnp.float32)

    # relu(agg + b') + prev  -> becomes prev for the next layer
    o_ref[...] = jnp.maximum(acc_ref[...] + b_ref[0], 0.0) + o_ref[...]


# ----------------------------------------------------------------------------
# pallas_call wrappers
# ----------------------------------------------------------------------------
def feature_transform(x, w, b, *, apply_relu, out_dtype=jnp.float32,
                      max_tile=256):
    """Row-tiled  x @ W + b  (+ optional ReLU).  All dims already 128-padded;
    W is expected in bf16."""
    n, f = x.shape
    h = w.shape[1]
    tm = _choose_tile(n, max_tile)
    kernel = functools.partial(_transform_kernel, apply_relu=apply_relu)
    return pl.pallas_call(
        kernel,
        out_shape=jax.ShapeDtypeStruct((n, h), out_dtype),
        grid=(n // tm,),
        in_specs=[
            pl.BlockSpec((tm, f), lambda i: (i, 0)),
            pl.BlockSpec((f, h), lambda i: (0, 0)),
            pl.BlockSpec((1, h), lambda i: (0, 0)),
        ],
        out_specs=pl.BlockSpec((tm, h), lambda i: (i, 0)),
        compiler_params=pltpu.CompilerParams(
            dimension_semantics=("parallel",)),
    )(x, w, b)


def graph_conv_layer(adj, xw, bias, residual, *, max_tile=1024):
    """relu(A @ xw + b') + residual, tiled over (rows, contraction)."""
    n = adj.shape[0]
    h = xw.shape[1]
    tk = _choose_tile(n, max_tile)
    tm = tk
    # Keep the row-grid extent even so the "parallel" axis shards across both
    # TensorCores on v7x megacore instead of leaving one idle.
    if n // tm > 1 and (n // tm) % 2 == 1 and tm % 256 == 0 and n % (tm // 2) == 0:
        tm //= 2

    # Keep xw fully VMEM-resident (one HBM fetch) whenever it fits; otherwise
    # fall back to streaming the tk chunk per step.
    xw_resident_bytes = 2 * n * h * xw.dtype.itemsize
    xw_resident = xw_resident_bytes <= XW_RESIDENT_CEILING

    budget = (2 * tm * tk * adj.dtype.itemsize                        # A, dbl-buf
              + (xw_resident_bytes if xw_resident
                 else 2 * tk * h * xw.dtype.itemsize)                 # xw
              + 2 * tm * h * residual.dtype.itemsize                  # residual
              + 2 * tm * h * 4                                        # f32 out
              + (4 << 20))                                            # slack
    vmem_limit = max(min(budget, 64 << 20), 16 << 20)

    if xw_resident:
        xw_spec = pl.BlockSpec((n, h), lambda i, k: (0, 0))
    else:
        xw_spec = pl.BlockSpec((tk, h), lambda i, k: (k, 0))

    kernel = functools.partial(_conv_agg_kernel, tk=tk, xw_resident=xw_resident)
    return pl.pallas_call(
        kernel,
        out_shape=jax.ShapeDtypeStruct((n, h), jnp.float32),
        grid=(n // tm, n // tk),
        in_specs=[
            pl.BlockSpec((tm, tk), lambda i, k: (i, k)),   # A tile (bf16)
            xw_spec,                                       # xw (bf16)
            pl.BlockSpec((1, h), lambda i, k: (0, 0)),     # folded bias
            pl.BlockSpec((tm, h), lambda i, k: (i, 0)),    # residual
        ],
        out_specs=pl.BlockSpec((tm, h), lambda i, k: (i, 0)),
        compiler_params=pltpu.CompilerParams(
            dimension_semantics=("parallel", "arbitrary"),
            vmem_limit_bytes=vmem_limit),
    )(adj, xw, bias, residual)


def fused_alternating_layers(adj, w_stack, b_stack, h0, *, vmem_limit_bytes):
    """Persistent kernel: all layers in one pallas_call, adjacencies resident.
    NOTE: the layer axis is sequential ("arbitrary"), so this path runs on a
    single TensorCore -- acceptable for the small/medium graphs it targets."""
    _, n_pad, _ = adj.shape
    num_layers, _, h = w_stack.shape
    return pl.pallas_call(
        _fused_layers_kernel,
        out_shape=jax.ShapeDtypeStruct((n_pad, h), jnp.float32),
        grid=(num_layers,),
        in_specs=[
            pl.BlockSpec((2, n_pad, n_pad), lambda l: (0, 0, 0)),  # both A's, resident
            pl.BlockSpec((1, h, h), lambda l: (l, 0, 0)),          # per-layer W'
            pl.BlockSpec((1, 1, h), lambda l: (l, 0, 0)),          # per-layer b'
            pl.BlockSpec((n_pad, h), lambda l: (0, 0)),            # h0, resident
        ],
        out_specs=pl.BlockSpec((n_pad, h), lambda l: (0, 0)),      # state, resident
        scratch_shapes=[pltpu.VMEM((n_pad, h), jnp.float32)],
        compiler_params=pltpu.CompilerParams(
            dimension_semantics=("arbitrary",),
            vmem_limit_bytes=vmem_limit_bytes),
    )(adj, w_stack, b_stack, h0)


# ----------------------------------------------------------------------------
# Plain-JAX glue: degree-normalized dense adjacency for one edge type,
# scattered directly into a pre-padded buffer and cast in one expression.
# (Replaces torch_sparse SparseTensor / degree().)
# ----------------------------------------------------------------------------
def build_norm_adj(edge_index, edge_weight, edge_type, type_idx, n, n_pad,
                   dtype=jnp.bfloat16):
    row, col = edge_index[0], edge_index[1]
    mask = (edge_type == type_idx).astype(jnp.float32)
    deg = jnp.zeros((n_pad,), jnp.float32).at[col].add(mask)
    d_norm_in = 1.0 / jnp.sqrt(deg[col])
    d_norm_out = 1.0 / jnp.sqrt(deg[row])
    value = edge_weight * mask * d_norm_in * d_norm_out
    value = jnp.nan_to_num(value, nan=0.0, posinf=0.0, neginf=0.0)
    # SparseTensor(row=col, col=row, value) densified: A[col, row] += value.
    # Scatter-add stays f32; the cast happens in the same expression.
    return jnp.zeros((n_pad, n_pad), jnp.float32).at[col, row].add(value).astype(dtype)
    # TODO(synk): for E << N^2 a block-sparse / CSR gather path (scalar
    # prefetch of row pointers) would avoid materializing O(N^2) bytes at all.


def _fused_vmem_budget(n_pad, h_pad):
    adj_b = 2 * (2 * n_pad * n_pad * 2)        # both bf16 adjacencies, x2 buffers
    state_b = 2 * (n_pad * h_pad * 4) * 2      # h0 + resident output, x2 buffers
    acc_b = n_pad * h_pad * 4                  # f32 aggregation scratch
    w_b = 2 * (h_pad * h_pad * 2 + h_pad * 4)  # per-layer weight + bias, dbl-buf
    return adj_b + state_b + acc_b + w_b + (4 << 20)


# ----------------------------------------------------------------------------
# Full forward pass of AlternatingGraphConv (inference)
# ----------------------------------------------------------------------------
def alternating_graph_conv_forward(x, edge_index, edge_type, edge_weight,
                                   params, num_layers, *, max_tile=None,
                                   path="auto"):
    n, f_in = x.shape
    hid = params["fc_w"].shape[1]
    if max_tile is None:
        max_tile = _default_max_tile()
    f_pad = _round_up(f_in, LANE)
    h_pad = _round_up(hid, LANE)
    # Pad N up to a multiple of the *target tile* so the tiled conv never
    # degenerates to 128x128 tiles on awkward N.
    tile_target = min(max_tile, _round_up(n, LANE))
    n_pad = _round_up(n, tile_target)

    # ---- input projection: relu(BN(x @ W0 + b0)) with BN folded into W0/b0
    w0, b0 = _fold_bn(params["fc_w"], params["fc_b"], params["bn_g"][0],
                      params["bn_b"][0], params["bn_m"][0], params["bn_v"][0])
    x_p = _pad2d(x, n_pad, f_pad).astype(jnp.bfloat16)
    w0_p = _pad2d(w0, f_pad, h_pad).astype(jnp.bfloat16)
    h0 = feature_transform(x_p, w0_p, _pad2d(b0, 1, h_pad), apply_relu=True,
                           out_dtype=jnp.float32)
    if num_layers == 0:
        return h0[:n, :hid]

    # ---- two degree-normalized bf16 adjacencies, built once (pre-padded)
    adj0 = build_norm_adj(edge_index, edge_weight, edge_type, 0, n, n_pad)
    adj1 = build_norm_adj(edge_index, edge_weight, edge_type, 1, n, n_pad)

    # ---- per-layer folded (BN into W/b) parameters
    w_list, b_list = [], []
    for i in range(num_layers):
        wi, bi = _fold_bn(params["conv_w"][i], params["conv_b"][i],
                          params["bn_g"][i + 1], params["bn_b"][i + 1],
                          params["bn_m"][i + 1], params["bn_v"][i + 1])
        w_list.append(_pad2d(wi, h_pad, h_pad).astype(jnp.bfloat16))
        b_list.append(_pad2d(bi, 1, h_pad))

    fused_budget = _fused_vmem_budget(n_pad, h_pad)
    use_fused = (path == "fused") or (path == "auto"
                                      and fused_budget <= FUSED_VMEM_CEILING)

    if use_fused:
        adj = jnp.stack([adj0, adj1])            # (2, n_pad, n_pad) bf16
        w_stack = jnp.stack(w_list)              # (L, h_pad, h_pad) bf16
        b_stack = jnp.stack(b_list)              # (L, 1, h_pad) f32
        vmem_limit = max(min(fused_budget, 64 << 20), 16 << 20)
        out = fused_alternating_layers(adj, w_stack, b_stack, h0,
                                       vmem_limit_bytes=vmem_limit)
    else:
        adjs = (adj0, adj1)
        zero_bias = jnp.zeros((1, h_pad), jnp.float32)
        prev = h0
        for i in range(num_layers):
            # reassociate (A @ x) @ W  ->  A @ (x @ W'); xw in bf16 for the MXU
            xw = feature_transform(prev, w_list[i], zero_bias,
                                   apply_relu=False, out_dtype=jnp.bfloat16)
            prev = graph_conv_layer(adjs[i % 2], xw, b_list[i], prev,
                                    max_tile=max_tile)
        out = prev
    return out[:n, :hid]


# ----------------------------------------------------------------------------
# Pure-JAX f32 reference (for correctness check)
# ----------------------------------------------------------------------------
def reference_forward(x, edge_index, edge_type, edge_weight, params,
                      num_layers):
    def bn(v, g, b, m, var):
        return (v - m) / jnp.sqrt(var + BN_EPS) * g + b

    n = x.shape[0]
    h = x @ params["fc_w"] + params["fc_b"]
    h = bn(h, params["bn_g"][0], params["bn_b"][0], params["bn_m"][0],
           params["bn_v"][0])
    h = jnp.maximum(h, 0.0)
    prev = h
    for i in range(num_layers):
        adj = build_norm_adj(edge_index, edge_weight, edge_type, i % 2, n, n,
                             dtype=jnp.float32)
        z = adj @ prev
        z = z @ params["conv_w"][i] + params["conv_b"][i]
        z = bn(z, params["bn_g"][i + 1], params["bn_b"][i + 1],
               params["bn_m"][i + 1], params["bn_v"][i + 1])
        z = jnp.maximum(z, 0.0)
        prev = z + prev
    return prev


# ----------------------------------------------------------------------------
if __name__ == "__main__":
    N = 256           # number of nodes
    IN_CH = 16        # in_channels
    HID = 32          # hidden_channels (lane-padded to 128 internally)
    NUM_LAYERS = 2
    E = 1024          # number of edges

    key = jax.random.PRNGKey(0)
    keys = jax.random.split(key, 16)

    # inputs
    x = jax.random.normal(keys[0], (N, IN_CH), jnp.float32)
    edge_index = jax.random.randint(keys[1], (2, E), 0, N, jnp.int32)
    edge_type = jax.random.randint(keys[2], (E,), 0, 2, jnp.int32)
    edge_weight = jax.random.uniform(keys[3], (E,), jnp.float32, 0.1, 1.0)

    # deterministic synthetic parameters
    def lin_init(k, fan_in, fan_out):
        bound = 1.0 / jnp.sqrt(fan_in)
        kw, kb = jax.random.split(k)
        w = jax.random.uniform(kw, (fan_in, fan_out), jnp.float32, -bound, bound)
        b = jax.random.uniform(kb, (1, fan_out), jnp.float32, -bound, bound)
        return w, b

    fc_w, fc_b = lin_init(keys[4], IN_CH, HID)
    conv_w, conv_b = [], []
    for i in range(NUM_LAYERS):
        w, b = lin_init(keys[5 + i], HID, HID)
        conv_w.append(w)
        conv_b.append(b)

    n_bn = NUM_LAYERS + 1
    bn_g = jax.random.uniform(keys[8], (n_bn, 1, HID), jnp.float32, 0.5, 1.5)
    bn_b = jax.random.normal(keys[9], (n_bn, 1, HID), jnp.float32) * 0.1
    bn_m = jax.random.normal(keys[10], (n_bn, 1, HID), jnp.float32) * 0.1
    bn_v = jax.random.uniform(keys[11], (n_bn, 1, HID), jnp.float32, 0.5, 1.5)

    params = dict(fc_w=fc_w, fc_b=fc_b, conv_w=conv_w, conv_b=conv_b,
                  bn_g=bn_g, bn_b=bn_b, bn_m=bn_m, bn_v=bn_v)

    ref = reference_forward(x, edge_index, edge_type, edge_weight, params,
                            NUM_LAYERS)

    # 1) default ("auto") path: at this size both bf16 adjacencies fit VMEM,
    #    so the persistent fused multi-layer kernel is exercised.
    out_fused = alternating_graph_conv_forward(x, edge_index, edge_type,
                                               edge_weight, params, NUM_LAYERS)
    out_fused = jax.block_until_ready(out_fused)
    assert out_fused.shape == (N, HID)
    # tolerance accounts for bf16 adjacency / activations on the MXU (f32 acc)
    assert jnp.allclose(out_fused, ref, rtol=2e-2, atol=2e-2), \
        "fused path mismatch vs reference"

    # 2) tiled (large-N) path, forced with max_tile=128 so the 256-padded
    #    adjacency produces a (2, 2) grid and the resident-xw slicing plus
    #    in-place output accumulation are genuinely exercised.
    out_tiled = alternating_graph_conv_forward(x, edge_index, edge_type,
                                               edge_weight, params, NUM_LAYERS,
                                               max_tile=128, path="tiled")
    out_tiled = jax.block_until_ready(out_tiled)
    assert out_tiled.shape == (N, HID)
    assert jnp.allclose(out_tiled, ref, rtol=2e-2, atol=2e-2), \
        "tiled path mismatch vs reference"

    print("KERNEL_OK")
</pallas_src>

<mosaic_0001>
module attributes {stable_mosaic.version = 11 : i64} {
  func.func @_transform_kernel(%arg0: i32, %arg1: memref<256x128xbf16, #tpu.memory_space<vmem>>, %arg2: memref<128x128xbf16, #tpu.memory_space<vmem>>, %arg3: memref<1x128xf32, #tpu.memory_space<vmem>>, %arg4: memref<256x128xf32, #tpu.memory_space<vmem>>) attributes {dimension_semantics = [#tpu.dimension_semantics<parallel>], iteration_bounds = array<i64: 1>, scalar_prefetch = 0 : i64, scratch_operands = 0 : i64, tpu.core_type = #tpu.core_type<tc>, window_params = [{transform_indices = @transform_0, window_bounds = array<i64: 256, 128>}, {pipeline_mode = #tpu.pipeline_mode<synchronous>, transform_indices = @transform_1, window_bounds = array<i64: 128, 128>}, {pipeline_mode = #tpu.pipeline_mode<synchronous>, transform_indices = @transform_2, window_bounds = array<i64: 1, 128>}, {transform_indices = @transform_3, window_bounds = array<i64: 256, 128>}]} {
    %c0 = arith.constant 0 : index
    %c0_0 = arith.constant 0 : index
    %0 = vector.load %arg1[%c0, %c0_0] : memref<256x128xbf16, #tpu.memory_space<vmem>>, vector<256x128xbf16>
    %c0_1 = arith.constant 0 : index
    %c0_2 = arith.constant 0 : index
    %1 = vector.load %arg2[%c0_1, %c0_2] : memref<128x128xbf16, #tpu.memory_space<vmem>>, vector<128x128xbf16>
    %cst = arith.constant dense<0.000000e+00> : vector<256x128xf32>
    %2 = tpu.matmul %0, %1, %cst {dimension_numbers = #tpu.dot_dimension_numbers<[1], [0], [0], [1], [0, 0, 1, 1], [], []>} : vector<256x128xbf16>, vector<128x128xbf16>, vector<256x128xf32> -> vector<256x128xf32>
    %c0_3 = arith.constant 0 : index
    %c0_4 = arith.constant 0 : index
    %3 = vector.load %arg3[%c0_3, %c0_4] : memref<1x128xf32, #tpu.memory_space<vmem>>, vector<1x128xf32>
    %4 = vector.broadcast %3 : vector<1x128xf32> to vector<256x128xf32>
    %5 = arith.addf %2, %4 : vector<256x128xf32>
    %cst_5 = arith.constant 0.000000e+00 : f32
    %6 = vector.broadcast %cst_5 : f32 to vector<256x128xf32>
    %7 = arith.maximumf %5, %6 : vector<256x128xf32>
    %c0_6 = arith.constant 0 : index
    %c0_7 = arith.constant 0 : index
    %8 = vector.load %arg4[%c0_6, %c0_7] : memref<256x128xf32, #tpu.memory_space<vmem>>, vector<256x128xf32>
    tpu.vector_store %arg4[%c0_6, %c0_7], %7 {strides = array<i32>} : memref<256x128xf32, #tpu.memory_space<vmem>>, vector<256x128xf32>,
    return
  }
  func.func @transform_0(%arg0: i32) -> (i32, i32) {
    %c0_i32 = arith.constant 0 : i32
    %c0_i32_0 = arith.constant 0 : i32
    return %arg0, %c0_i32 : i32, i32
  }
  func.func @transform_1(%arg0: i32) -> (i32, i32) {
    %c0_i32 = arith.constant 0 : i32
    %c0_i32_0 = arith.constant 0 : i32
    %c0_i32_1 = arith.constant 0 : i32
    return %c0_i32, %c0_i32_0 : i32, i32
  }
  func.func @transform_2(%arg0: i32) -> (i32, i32) {
    %c0_i32 = arith.constant 0 : i32
    %c0_i32_0 = arith.constant 0 : i32
    %c0_i32_1 = arith.constant 0 : i32
    return %c0_i32, %c0_i32_0 : i32, i32
  }
  func.func @transform_3(%arg0: i32) -> (i32, i32) {
    %c0_i32 = arith.constant 0 : i32
    %c0_i32_0 = arith.constant 0 : i32
    return %arg0, %c0_i32 : i32, i32
  }
}

</mosaic_0001>

<bundles_post_ra>
// kernel: tpu_custom_call.1
= control target key start
LH: loop header
LB: loop body
LE: loop exit
PB: predicated region body
PF: predicated region fallthrough
CT: control target
= control target key end

     0   :  { %8 = vsyncpa [#allocation3], 0  ;;  %s802_s0 = inlined_call_operand.hbm [shape: bf16[256,128], index: 0, kind: input, shape index: {}]   ;;  %s803_s1 = inlined_call_operand.hbm [shape: bf16[128,128], index: 1, kind: input, shape index: {}]   ;;  %s804_s2 = inlined_call_operand.vmem [shape: f32[1,128], index: 2, kind: input, shape index: {}]   ;;  %s805_s3 = inlined_call_operand.hbm [shape: f32[256,128], index: 3, kind: output, shape index: {}]  }
   0x1   :  { %9 = vsyncpa [#allocation6], 0 }
   0x2   :  { %10 = vsyncpa [#allocation4], 0  ;;  %s702_s12 = smov [#allocation2]   ;;  %s630_s16 = scalar_lea.hbm %s802_s0, 2048 }
   0x3   :  { %s16_s13 = sshll.u32 %s702_s12, 4  ;;  %p631_p0 = scmp.ne.s32.totalorder %s802_s0, %s630_s16  ;;  %s17_s13 = int_to_ptr.vmem [resolvable:$true] %s16_s13 }
   0x4   :  { %p634_p1 = scmp.lt.u32.totalorder %s630_s16, %s802_s0 }
   0x6   :  { %p636_p2 = pnand %p634_p1, %p631_p0 }
   0x8   :  { %639 = shalt.err (!%p636_p2)
}
   0x9   :  { %s640_s21 = scalar_lea.vmem %s17_s13, 2048  ;;  %p645_p4 = scmp.lt.s32.totalorder %s17_s13, %s17_s13 }
   0xa   :  { %p641_p3 = scmp.ne.s32.totalorder %s17_s13, %s640_s21  ;;  %p646_p5 = scmp.lt.s32.totalorder %s640_s21, %s640_s21 }
   0xc   :  { %p647_p6 = por %p646_p5, %p645_p4 }
   0xe   :  { %p648_p7 = pnand %p647_p6, %p641_p3 }
  0x10   :  { %651 = shalt.err (!%p648_p7)
}
  0x11   :  { %s703_s22 = smov 64   ;;  %s704_s23 = smov 4  }
  0x12   :  { %22 = dma.hbm_to_vmem [thread:$0]  %s802_s0, 2048, %s17_s13, [#allocation3], %s703_s22, %s703_s22, %s704_s23  }
  0x13   :  { %s705_s26 = smov [#allocation5]   ;;  %s652_s30 = scalar_lea.hbm %s803_s1, 1024 }
  0x14   :  { %s28_s27 = sshll.u32 %s705_s26, 4  ;;  %p653_p8 = scmp.ne.s32.totalorder %s803_s1, %s652_s30  ;;  %s29_s27 = int_to_ptr.vmem [resolvable:$true] %s28_s27 }
  0x15   :  { %p656_p9 = scmp.lt.u32.totalorder %s652_s30, %s803_s1 }
  0x17   :  { %p658_p10 = pnand %p656_p9, %p653_p8 }
  0x19   :  { %661 = shalt.err (!%p658_p10)
}
  0x1a   :  { %s662_s8 = scalar_lea.vmem %s29_s27, 1024  ;;  %p667_p12 = scmp.lt.s32.totalorder %s29_s27, %s29_s27 }
  0x1b   :  { %p663_p11 = scmp.ne.s32.totalorder %s29_s27, %s662_s8  ;;  %p668_p13 = scmp.lt.s32.totalorder %s662_s8, %s662_s8 }
  0x1d   :  { %p669_p0 = por %p668_p13, %p667_p12 }
  0x1f   :  { %p670_p1 = pnand %p669_p0, %p663_p11 }
  0x21   :  { %673 = shalt.err (!%p670_p1)
}
  0x22   :  { %34 = dma.hbm_to_vmem [thread:$0]  %s803_s1, 1024, %s29_s27, [#allocation6], %s703_s22, %s703_s22, %s704_s23  }
  0x23   :  { %696 = dma.done.wait [#allocation3], 2048  }
  0x24   :  { %697 = vsyncadd [#allocation3], 4294965248 }
  0x25   :  { %698 = dma.done.wait [#allocation6], 1024  }
  0x26   :  { %699 = vsyncadd [#allocation6], 4294966272  ;;  %v606_v0 = vld [vmem:[#allocation5] sm:$0xff]   ;;  %v607_v1 = vld [vmem:[#allocation5 + $0x8] sm:$0xff]  }
  0x27   :  { %535 = vmatprep.subr.bf16.mxu0 %v606_v0  ;;  %583 = vmatprep.subr.bf16.mxu1 %v606_v0  ;;  %v608_v2 = vld [vmem:[#allocation5 + $0x10] sm:$0xff]   ;;  %v609_v3 = vld [vmem:[#allocation5 + $0x18] sm:$0xff]   ;;  %v614_v4 = vld [vmem:[#allocation2] sm:$0xff]  }
  0x28   :  { %536 = vmatpush3.bf16.msra.mxu0 %v606_v0  ;;  %591 = vmatpush3.bf16.msra.mxu1 %v606_v0  ;;  %v615_v5 = vld [vmem:[#allocation2 + $0x40] sm:$0xff]   ;;  %v611_v7 = vld [vmem:[#allocation5 + $0x28] sm:$0xff]   ;;  %v612_v8 = vld [vmem:[#allocation5 + $0x30] sm:$0xff]  }
  0x29   :  { %537 = vmatprep.subr.bf16.mxu0 %v607_v1  ;;  %584 = vmatprep.subr.bf16.mxu1 %v607_v1  ;;  %v610_v6 = vld [vmem:[#allocation5 + $0x20] sm:$0xff]   ;;  %v613_v9 = vld [vmem:[#allocation5 + $0x38] sm:$0xff]   ;;  %v616_v10 = vld [vmem:[#allocation2 + $0x8] sm:$0xff]  }
  0x2a   :  { %551 = vmatprep.mubr.bf16.mxu0 %v614_v4  ;;  %567 = vmatprep.mubr.bf16.mxu1 %v615_v5  ;;  %v617_v11 = vld [vmem:[#allocation2 + $0x48] sm:$0xff]   ;;  %v618_v12 = vld [vmem:[#allocation2 + $0x10] sm:$0xff]   ;;  %v620_v14 = vld [vmem:[#allocation2 + $0x18] sm:$0xff]  }
  0x2b   :  { %v619_v13 = vld [vmem:[#allocation2 + $0x50] sm:$0xff]   ;;  %v621_v15 = vld [vmem:[#allocation2 + $0x58] sm:$0xff]   ;;  %v622_v16 = vld [vmem:[#allocation2 + $0x20] sm:$0xff]  }
  0x2c   :  { %538 = vmatpush3.bf16.msra.mxu0 %v607_v1  ;;  %592 = vmatpush3.bf16.msra.mxu1 %v607_v1  ;;  %v623_v17 = vld [vmem:[#allocation2 + $0x60] sm:$0xff]   ;;  %v624_v18 = vld [vmem:[#allocation2 + $0x28] sm:$0xff]   ;;  %v626_v20 = vld [vmem:[#allocation2 + $0x30] sm:$0xff]  }
  0x2d   :  { %539 = vmatprep.subr.bf16.mxu0 %v608_v2  ;;  %585 = vmatprep.subr.bf16.mxu1 %v608_v2  ;;  %v625_v19 = vld [vmem:[#allocation2 + $0x68] sm:$0xff]   ;;  %v627_v21 = vld [vmem:[#allocation2 + $0x70] sm:$0xff]   ;;  %v628_v22 = vld [vmem:[#allocation2 + $0x38] sm:$0xff]  }
  0x2e   :  { %v629_v23 = vld [vmem:[#allocation2 + $0x78] sm:$0xff]   ;;  %v756_v24 = vld [vmem:[%s804_s2] ss:$0 sm:$0xff]  ;;  %s706_s2 = smov [#allocation7]  }
  0x2f   :  { %s473_s11 = sshll.u32 %s706_s2, 4  ;;  %s474_s11 = int_to_ptr.vmem [resolvable:$true] %s473_s11 }
  0x30   :  { %540 = vmatpush3.bf16.msra.mxu0 %v608_v2  ;;  %593 = vmatpush3.bf16.msra.mxu1 %v608_v2  ;;  %s674_s12 = scalar_lea.vmem %s474_s11, 4096  ;;  %p679_p3 = scmp.lt.s32.totalorder %s474_s11, %s474_s11 }
  0x31   :  { %541 = vmatprep.subr.bf16.mxu0 %v609_v3  ;;  %586 = vmatprep.subr.bf16.mxu1 %v609_v3  ;;  %p675_p2 = scmp.ne.s32.totalorder %s474_s11, %s674_s12  ;;  %p680_p4 = scmp.lt.s32.totalorder %s674_s12, %s674_s12 }
  0x33   :  { %p681_p5 = por %p680_p4, %p679_p3 }
  0x34   :  { %542 = vmatpush3.bf16.msra.mxu0 %v609_v3  ;;  %594 = vmatpush3.bf16.msra.mxu1 %v609_v3 }
  0x35   :  { %543 = vmatprep.subr.bf16.mxu0 %v610_v6  ;;  %587 = vmatprep.subr.bf16.mxu1 %v610_v6  ;;  %p682_p6 = pnand %p681_p5, %p675_p2 }
  0x38   :  { %544 = vmatpush3.bf16.msra.mxu0 %v610_v6  ;;  %595 = vmatpush3.bf16.msra.mxu1 %v610_v6 }
  0x39   :  { %545 = vmatprep.subr.bf16.mxu0 %v611_v7  ;;  %588 = vmatprep.subr.bf16.mxu1 %v611_v7 }
  0x3c   :  { %546 = vmatpush3.bf16.msra.mxu0 %v611_v7  ;;  %596 = vmatpush3.bf16.msra.mxu1 %v611_v7 }
  0x3d   :  { %547 = vmatprep.subr.bf16.mxu0 %v612_v8  ;;  %589 = vmatprep.subr.bf16.mxu1 %v612_v8 }
  0x40   :  { %548 = vmatpush3.bf16.msra.mxu0 %v612_v8  ;;  %597 = vmatpush3.bf16.msra.mxu1 %v612_v8 }
  0x41   :  { %549 = vmatprep.subr.bf16.mxu0 %v613_v9  ;;  %590 = vmatprep.subr.bf16.mxu1 %v613_v9 }
  0x44   :  { %550 = vmatpush3.bf16.msra.mxu0 %v613_v9  ;;  %598 = vmatpush3.bf16.msra.mxu1 %v613_v9 }
  0x47   :  { %552 = vmatmul.mubr.bf16.vlgmr.msra.gmra.mrb[0].mxu0 %v616_v10  ;;  %568 = vmatmul.mubr.bf16.vlgmr.msra.gmra.mrb[0].mxu1 %v617_v11 }
  0x48   :  { %555 = vmatprep.mubr.bf16.mxu0 %v618_v12  ;;  %571 = vmatprep.mubr.bf16.mxu1 %v619_v13 }
  0x4f   :  { %556 = vmatmul.mubr.bf16.gmra.mrb[4].mxu0 %v620_v14  ;;  %572 = vmatmul.mubr.bf16.gmra.mrb[4].mxu1 %v621_v15 }
  0x50   :  { %559 = vmatprep.mubr.bf16.mxu0 %v622_v16  ;;  %575 = vmatprep.mubr.bf16.mxu1 %v623_v17 }
  0x57   :  { %560 = vmatmul.mubr.bf16.gmra.mrb[8].mxu0 %v624_v18  ;;  %576 = vmatmul.mubr.bf16.gmra.mrb[8].mxu1 %v625_v19 }
  0x58   :  { %563 = vmatprep.mubr.bf16.mxu0 %v626_v20  ;;  %579 = vmatprep.mubr.bf16.mxu1 %v627_v21 }
  0x5f   :  { %564 = vmatmul.mubr.bf16.gmra.mrb[12].mxu0 %v628_v22  ;;  %580 = vmatmul.mubr.bf16.gmra.mrb[12].mxu1 %v629_v23 }
 0x11a   :  { %v553_v25 = vpop.f32.mrb[0].mxu0  ;;  %v569_v26 = vpop.f32.mrb[0].mxu1 }
 0x11b   :  { %v286_v27 = vadd.f32 %v553_v25, %v756_v24  ;;  %v350_v28 = vadd.f32 %v569_v26, %v756_v24  ;;  %v277_v29 = vpop.f32.mrb[1].mxu0  ;;  %v341_v30 = vpop.f32.mrb[1].mxu1 }
 0x11c   :  { %v278_v31 = vadd.f32 %v756_v24, %v277_v29  ;;  %v342_v32 = vadd.f32 %v756_v24, %v341_v30  ;;  %v554_v33 = vpop.f32.mrb[2].mxu0  ;;  %v570_v34 = vpop.f32.mrb[2].mxu1 }
 0x11d   :  { %v406_v35 = vmax.f32 %v286_v27, 0.0  ;;  %v422_v36 = vmax.f32 %v350_v28, 0.0  ;;  %v289_v37 = vadd.f32 %v554_v33, %v756_v24  ;;  %v353_v38 = vadd.f32 %v570_v34, %v756_v24  ;;  %v280_v39 = vpop.f32.mrb[3].mxu0  ;;  %v344_v40 = vpop.f32.mrb[3].mxu1 }
 0x11e   :  { %v404_v41 = vmax.f32 %v278_v31, 0.0  ;;  %v420_v42 = vmax.f32 %v342_v32, 0.0  ;;  %v281_v43 = vadd.f32 %v756_v24, %v280_v39  ;;  %v345_v44 = vadd.f32 %v756_v24, %v344_v40 }
 0x11f   :  { %438 = vst [vmem:[#allocation7 + $0x10] sm:$0xff] %v406_v35  ;;  %454 = vst [vmem:[#allocation7 + $0x90] sm:$0xff] %v422_v36  ;;  %v407_v45 = vmax.f32 %v289_v37, 0.0  ;;  %v423_v46 = vmax.f32 %v353_v38, 0.0 }
 0x120   :  { %436 = vst [vmem:[#allocation7] sm:$0xff] %v404_v41  ;;  %452 = vst [vmem:[#allocation7 + $0x80] sm:$0xff] %v420_v42  ;;  %v405_v47 = vmax.f32 %v281_v43, 0.0  ;;  %v421_v48 = vmax.f32 %v345_v44, 0.0 }
 0x121   :  { %439 = vst [vmem:[#allocation7 + $0x18] sm:$0xff] %v407_v45  ;;  %455 = vst [vmem:[#allocation7 + $0x98] sm:$0xff] %v423_v46 }
 0x122   :  { %437 = vst [vmem:[#allocation7 + $0x8] sm:$0xff] %v405_v47  ;;  %453 = vst [vmem:[#allocation7 + $0x88] sm:$0xff] %v421_v48  ;;  %v557_v49 = vpop.f32.mrb[4].mxu0  ;;  %v573_v50 = vpop.f32.mrb[4].mxu1 }
 0x123   :  { %v302_v51 = vadd.f32 %v557_v49, %v756_v24  ;;  %v366_v52 = vadd.f32 %v573_v50, %v756_v24  ;;  %v293_v53 = vpop.f32.mrb[5].mxu0  ;;  %v357_v54 = vpop.f32.mrb[5].mxu1 }
 0x124   :  { %v294_v55 = vadd.f32 %v756_v24, %v293_v53  ;;  %v358_v56 = vadd.f32 %v756_v24, %v357_v54  ;;  %v558_v57 = vpop.f32.mrb[6].mxu0  ;;  %v574_v58 = vpop.f32.mrb[6].mxu1 }
 0x125   :  { %v410_v59 = vmax.f32 %v302_v51, 0.0  ;;  %v426_v60 = vmax.f32 %v366_v52, 0.0  ;;  %v305_v61 = vadd.f32 %v558_v57, %v756_v24  ;;  %v369_v62 = vadd.f32 %v574_v58, %v756_v24  ;;  %v296_v63 = vpop.f32.mrb[7].mxu0  ;;  %v360_v0 = vpop.f32.mrb[7].mxu1 }
 0x126   :  { %v408_v1 = vmax.f32 %v294_v55, 0.0  ;;  %v424_v2 = vmax.f32 %v358_v56, 0.0  ;;  %v297_v3 = vadd.f32 %v756_v24, %v296_v63  ;;  %v361_v4 = vadd.f32 %v756_v24, %v360_v0 }
 0x127   :  { %442 = vst [vmem:[#allocation7 + $0x30] sm:$0xff] %v410_v59  ;;  %458 = vst [vmem:[#allocation7 + $0xb0] sm:$0xff] %v426_v60  ;;  %v411_v5 = vmax.f32 %v305_v61, 0.0  ;;  %v427_v6 = vmax.f32 %v369_v62, 0.0 }
 0x128   :  { %440 = vst [vmem:[#allocation7 + $0x20] sm:$0xff] %v408_v1  ;;  %456 = vst [vmem:[#allocation7 + $0xa0] sm:$0xff] %v424_v2  ;;  %v409_v7 = vmax.f32 %v297_v3, 0.0  ;;  %v425_v8 = vmax.f32 %v361_v4, 0.0 }
 0x129   :  { %443 = vst [vmem:[#allocation7 + $0x38] sm:$0xff] %v411_v5  ;;  %459 = vst [vmem:[#allocation7 + $0xb8] sm:$0xff] %v427_v6 }
 0x12a   :  { %441 = vst [vmem:[#allocation7 + $0x28] sm:$0xff] %v409_v7  ;;  %457 = vst [vmem:[#allocation7 + $0xa8] sm:$0xff] %v425_v8  ;;  %v561_v9 = vpop.f32.mrb[8].mxu0  ;;  %v577_v10 = vpop.f32.mrb[8].mxu1 }
 0x12b   :  { %v318_v11 = vadd.f32 %v561_v9, %v756_v24  ;;  %v382_v12 = vadd.f32 %v577_v10, %v756_v24  ;;  %v309_v13 = vpop.f32.mrb[9].mxu0  ;;  %v373_v14 = vpop.f32.mrb[9].mxu1 }
 0x12c   :  { %v310_v15 = vadd.f32 %v756_v24, %v309_v13  ;;  %v374_v16 = vadd.f32 %v756_v24, %v373_v14  ;;  %v562_v17 = vpop.f32.mrb[10].mxu0  ;;  %v578_v18 = vpop.f32.mrb[10].mxu1 }
 0x12d   :  { %v414_v19 = vmax.f32 %v318_v11, 0.0  ;;  %v430_v20 = vmax.f32 %v382_v12, 0.0  ;;  %v321_v21 = vadd.f32 %v562_v17, %v756_v24  ;;  %v385_v22 = vadd.f32 %v578_v18, %v756_v24  ;;  %v312_v23 = vpop.f32.mrb[11].mxu0  ;;  %v376_v25 = vpop.f32.mrb[11].mxu1 }
 0x12e   :  { %v412_v26 = vmax.f32 %v310_v15, 0.0  ;;  %v428_v27 = vmax.f32 %v374_v16, 0.0  ;;  %v313_v28 = vadd.f32 %v756_v24, %v312_v23  ;;  %v377_v29 = vadd.f32 %v756_v24, %v376_v25 }
 0x12f   :  { %446 = vst [vmem:[#allocation7 + $0x50] sm:$0xff] %v414_v19  ;;  %462 = vst [vmem:[#allocation7 + $0xd0] sm:$0xff] %v430_v20  ;;  %v415_v30 = vmax.f32 %v321_v21, 0.0  ;;  %v431_v31 = vmax.f32 %v385_v22, 0.0 }
 0x130   :  { %444 = vst [vmem:[#allocation7 + $0x40] sm:$0xff] %v412_v26  ;;  %460 = vst [vmem:[#allocation7 + $0xc0] sm:$0xff] %v428_v27  ;;  %v413_v32 = vmax.f32 %v313_v28, 0.0  ;;  %v429_v33 = vmax.f32 %v377_v29, 0.0 }
 0x131   :  { %447 = vst [vmem:[#allocation7 + $0x58] sm:$0xff] %v415_v30  ;;  %463 = vst [vmem:[#allocation7 + $0xd8] sm:$0xff] %v431_v31 }
 0x132   :  { %445 = vst [vmem:[#allocation7 + $0x48] sm:$0xff] %v413_v32  ;;  %461 = vst [vmem:[#allocation7 + $0xc8] sm:$0xff] %v429_v33  ;;  %v565_v34 = vpop.f32.mrb[12].mxu0  ;;  %v581_v35 = vpop.f32.mrb[12].mxu1 }
 0x133   :  { %v334_v36 = vadd.f32 %v565_v34, %v756_v24  ;;  %v398_v37 = vadd.f32 %v581_v35, %v756_v24  ;;  %v325_v38 = vpop.f32.mrb[13].mxu0  ;;  %v389_v39 = vpop.f32.mrb[13].mxu1 }
 0x134   :  { %v326_v40 = vadd.f32 %v756_v24, %v325_v38  ;;  %v390_v41 = vadd.f32 %v756_v24, %v389_v39  ;;  %v566_v42 = vpop.f32.mrb[14].mxu0  ;;  %v582_v43 = vpop.f32.mrb[14].mxu1 }
 0x135   :  { %v418_v44 = vmax.f32 %v334_v36, 0.0  ;;  %v434_v45 = vmax.f32 %v398_v37, 0.0  ;;  %v337_v46 = vadd.f32 %v566_v42, %v756_v24  ;;  %v401_v47 = vadd.f32 %v582_v43, %v756_v24  ;;  %v328_v48 = vpop.f32.mrb[15].mxu0  ;;  %v392_v49 = vpop.f32.mrb[15].mxu1 }
 0x136   :  { %v416_v50 = vmax.f32 %v326_v40, 0.0  ;;  %v432_v51 = vmax.f32 %v390_v41, 0.0  ;;  %v329_v52 = vadd.f32 %v756_v24, %v328_v48  ;;  %v393_v53 = vadd.f32 %v756_v24, %v392_v49 }
 0x137   :  { %450 = vst [vmem:[#allocation7 + $0x70] sm:$0xff] %v418_v44  ;;  %466 = vst [vmem:[#allocation7 + $0xf0] sm:$0xff] %v434_v45  ;;  %v419_v54 = vmax.f32 %v337_v46, 0.0  ;;  %v435_v55 = vmax.f32 %v401_v47, 0.0 }
 0x138   :  { %448 = vst [vmem:[#allocation7 + $0x60] sm:$0xff] %v416_v50  ;;  %464 = vst [vmem:[#allocation7 + $0xe0] sm:$0xff] %v432_v51  ;;  %v417_v56 = vmax.f32 %v329_v52, 0.0  ;;  %v433_v57 = vmax.f32 %v393_v53, 0.0 }
 0x139   :  { %451 = vst [vmem:[#allocation7 + $0x78] sm:$0xff] %v419_v54  ;;  %467 = vst [vmem:[#allocation7 + $0xf8] sm:$0xff] %v435_v55 }
 0x13a   :  { %449 = vst [vmem:[#allocation7 + $0x68] sm:$0xff] %v417_v56  ;;  %465 = vst [vmem:[#allocation7 + $0xe8] sm:$0xff] %v433_v57 }
 0x13b   :  { %685 = shalt.err (!%p682_p6)
}
 0x13c   :  { %s686_s15 = scalar_lea.hbm %s805_s3, 4096 }
 0x13d   :  { %p687_p7 = scmp.ne.s32.totalorder %s805_s3, %s686_s15  ;;  %p690_p8 = scmp.lt.u32.totalorder %s686_s15, %s805_s3 }
 0x13f   :  { %p692_p9 = pnand %p690_p8, %p687_p7 }
 0x141   :  { %695 = shalt.err (!%p692_p9)
}
 0x142   :  { %s707_s20 = smov 128   ;;  %s708_s21 = smov 8  }
 0x143   :  { %479 = dma.vmem_to_hbm [thread:$0]  %s474_s11, 4096, %s805_s3, [#allocation4], %s707_s20, %s707_s20, %s708_s21  }
 0x144   :  { %700 = dma.done.wait [#allocation4], 4096  }
 0x145   :  { %701 = vsyncadd [#allocation4], 4294963200 }
 0x146   :  { %483 = vsyncpa [#allocation3], 1 }
 0x147   :  { %484 = vsyncpa [#allocation6], 1 }
 0x148   :  { %485 = vsyncpa [#allocation4], 1 }

</bundles_post_ra>
